<compile_context>
chip_gen: v5e
topology: v5e:2x2
jax: 0.10.0
libtpu: 0.0.40
codegen_flags: <defaults>
</compile_context>

<pallas_src>
import functools

import jax
import jax.numpy as jnp
from jax.experimental import pallas as pl
from jax.experimental.pallas import tpu as pltpu


def _masked_mean_kernel(h_ref, m_ref, invd_ref, o_ref, acc_ref):
    # h_ref: [Bt, St, Ht]   m_ref: [Bt, St, 1]   invd_ref: [Bt, 1]
    # o_ref: [Bt, Ht]       acc_ref: [Bt, Ht] f32 scratch accumulator
    s_idx = pl.program_id(2)

    @pl.when(s_idx == 0)
    def _():
        acc_ref[...] = jnp.zeros_like(acc_ref)

    # Masked partial sum over this sequence chunk, accumulated in f32 directly
    # (no separate full-tile f32 materialization kept live).
    acc_ref[...] += jnp.sum(
        h_ref[...].astype(jnp.float32) * m_ref[...].astype(jnp.float32), axis=1)

    @pl.when(s_idx == pl.num_programs(2) - 1)
    def _():
        # Multiply by the precomputed (clamped) reciprocal of the mask sum.
        o_ref[...] = (acc_ref[...] * invd_ref[...]).astype(o_ref.dtype)


def _plain_mean_kernel(h_ref, o_ref, acc_ref, *, inv_len):
    # attention_mask=None path: plain mean over the sequence axis.
    s_idx = pl.program_id(2)

    @pl.when(s_idx == 0)
    def _():
        acc_ref[...] = jnp.zeros_like(acc_ref)

    acc_ref[...] += jnp.sum(h_ref[...].astype(jnp.float32), axis=1)

    @pl.when(s_idx == pl.num_programs(2) - 1)
    def _():
        o_ref[...] = (acc_ref[...] * inv_len).astype(o_ref.dtype)


def _largest_divisor_tile(dim, candidates):
    for c in candidates:
        if c <= dim and dim % c == 0:
            return c
    return dim


def _pick_tiles(B, S, H, itemsize):
    # Batch tile: whole batch if small, otherwise sublane-friendly 8.
    b_t = B if (B <= 8 or B % 8 != 0) else 8
    # Hidden (lane) tile: multiple of 128 when possible for lane-dense stores.
    h_t = _largest_divisor_tile(H, (512, 384, 256, 128))
    # Sequence tile: cap the per-block footprint around 4 MiB so the two
    # double-buffered inputs plus the accumulator stay well under the default
    # 32 MiB scoped VMEM on every generation (v7x has only 64 MiB per TC).
    budget = 4 * 1024 * 1024
    max_s = max(8, budget // max(1, b_t * h_t * itemsize))
    s_cands = tuple(c for c in (1024, 512, 256, 128, 64, 32, 16, 8) if c <= max_s)
    s_t = _largest_divisor_tile(S, s_cands if s_cands else (8,))
    return b_t, s_t, h_t


def mean_pooling(hidden_states, input_ids=None, attention_mask=None):
    """Pallas equivalent of MeanPooling.forward.

    hidden_states:  [B, S, H]
    input_ids:      unused (kept for signature parity with the PyTorch module)
    attention_mask: [B, S] (any numeric/bool dtype) or None
    returns:        [B, H]; float32 when a mask is given (matches the PyTorch
                    `.float()` promotion), else hidden_states.dtype.
    """
    B, S, H = hidden_states.shape
    itemsize = jnp.dtype(hidden_states.dtype).itemsize
    b_t, s_t, h_t = _pick_tiles(B, S, H, itemsize)
    grid = (B // b_t, H // h_t, S // s_t)   # reduction (S) axis last

    compiler_params = pltpu.CompilerParams(
        # B and H tiles are independent -> megacore-parallel on v7x;
        # S is the reduction axis -> arbitrary.
        dimension_semantics=("parallel", "parallel", "arbitrary"),
        vmem_limit_bytes=32 * 1024 * 1024,
    )

    if attention_mask is None:
        # No mask: skip the mask DMA/multiply entirely, divide by the static S.
        kernel = functools.partial(_plain_mean_kernel, inv_len=float(1.0 / S))
        return pl.pallas_call(
            kernel,
            out_shape=jax.ShapeDtypeStruct((B, H), hidden_states.dtype),
            grid_spec=pltpu.PrefetchScalarGridSpec(
                num_scalar_prefetch=0,
                grid=grid,
                in_specs=[
                    pl.BlockSpec((b_t, s_t, h_t), lambda b, h, s: (b, s, h)),
                ],
                out_specs=pl.BlockSpec((b_t, h_t), lambda b, h, s: (b, h)),
                scratch_shapes=[pltpu.VMEM((b_t, h_t), jnp.float32)],
            ),
            compiler_params=compiler_params,
        )(hidden_states)

    # Hoist the denominator out of the kernel: a tiny [B,S] -> [B,1] XLA
    # reduction, clamped so fully-masked rows don't produce NaN/Inf, inverted
    # once so the kernel finalize is a multiply rather than a divide.
    mask_f = attention_mask.astype(jnp.float32)
    denom = jnp.maximum(jnp.sum(mask_f, axis=1, keepdims=True), 1e-9)
    inv_denom = 1.0 / denom                       # [B, 1] f32
    mask3d = mask_f[:, :, None]                   # [B, S, 1] (trailing unit dim)

    return pl.pallas_call(
        _masked_mean_kernel,
        out_shape=jax.ShapeDtypeStruct((B, H), jnp.float32),
        grid_spec=pltpu.PrefetchScalarGridSpec(
            num_scalar_prefetch=0,
            grid=grid,
            in_specs=[
                pl.BlockSpec((b_t, s_t, h_t), lambda b, h, s: (b, s, h)),
                pl.BlockSpec((b_t, s_t, 1), lambda b, h, s: (b, s, 0)),
                pl.BlockSpec((b_t, 1), lambda b, h, s: (b, 0)),
            ],
            out_specs=pl.BlockSpec((b_t, h_t), lambda b, h, s: (b, h)),
            scratch_shapes=[pltpu.VMEM((b_t, h_t), jnp.float32)],
        ),
        compiler_params=compiler_params,
    )(hidden_states, mask3d, inv_denom)


if __name__ == "__main__":
    key = jax.random.PRNGKey(0)
    k_h, _ = jax.random.split(key)

    B, S, H = 2, 8, 32
    hidden_states = jax.random.normal(k_h, (B, S, H), dtype=jnp.float32)
    input_ids = jnp.arange(B * S, dtype=jnp.int32).reshape(B, S)  # unused by forward
    # deterministic mask: first batch keeps 5 tokens, second keeps 7
    attention_mask = jnp.array(
        [[1, 1, 1, 1, 1, 0, 0, 0],
         [1, 1, 1, 1, 1, 1, 1, 0]], dtype=jnp.int32)

    out = jax.block_until_ready(mean_pooling(hidden_states, input_ids, attention_mask))

    # reference check (plain JAX)
    mf = attention_mask.astype(jnp.float32)
    ref = jnp.sum(hidden_states * mf[:, :, None], axis=1) / jnp.sum(
        mf, axis=1, keepdims=True)
    assert out.shape == (B, H)
    assert out.dtype == jnp.float32
    assert jnp.allclose(out, ref, atol=1e-5, rtol=1e-5)

    # attention_mask=None path (plain mean over seq)
    out_none = jax.block_until_ready(mean_pooling(hidden_states, input_ids, None))
    assert jnp.allclose(out_none, jnp.mean(hidden_states, axis=1), atol=1e-5, rtol=1e-5)

    print("KERNEL_OK")
</pallas_src>

<mosaic_0001>
module attributes {stable_mosaic.version = 11 : i64} {
  func.func @_masked_mean_kernel(%arg0: i32, %arg1: i32, %arg2: i32, %arg3: memref<2x8x32xf32, #tpu.memory_space<vmem>>, %arg4: memref<2x8x1xf32, #tpu.memory_space<vmem>>, %arg5: memref<2x1xf32, #tpu.memory_space<vmem>>, %arg6: memref<2x32xf32, #tpu.memory_space<vmem>>, %arg7: memref<2x32xf32, #tpu.memory_space<vmem>>) attributes {dimension_semantics = [#tpu.dimension_semantics<parallel>, #tpu.dimension_semantics<parallel>, #tpu.dimension_semantics<arbitrary>], iteration_bounds = array<i64: 1, 1, 1>, scalar_prefetch = 0 : i64, scratch_operands = 1 : i64, tpu.core_type = #tpu.core_type<tc>, window_params = [{transform_indices = @transform_0, window_bounds = array<i64: 2, 8, 32>}, {transform_indices = @transform_1, window_bounds = array<i64: 2, 8, 1>}, {transform_indices = @transform_2, window_bounds = array<i64: 2, 1>}, {transform_indices = @transform_3, window_bounds = array<i64: 2, 32>}]} {
    %c0_i32 = arith.constant 0 : i32
    %0 = arith.cmpi eq, %arg2, %c0_i32 : i32
    %1 = arith.extui %0 : i1 to i32
    %c0_i32_0 = arith.constant 0 : i32
    %2 = arith.cmpi ne, %1, %c0_i32_0 : i32
    scf.if %2 {
      %cst_12 = arith.constant 0.000000e+00 : f32
      %14 = vector.broadcast %cst_12 : f32 to vector<2x32xf32>
      %c0_13 = arith.constant 0 : index
      %c0_14 = arith.constant 0 : index
      %15 = vector.load %arg7[%c0_13, %c0_14] : memref<2x32xf32, #tpu.memory_space<vmem>>, vector<2x32xf32>
      tpu.vector_store %arg7[%c0_13, %c0_14], %14 {strides = array<i32>} : memref<2x32xf32, #tpu.memory_space<vmem>>, vector<2x32xf32>,
    } else {
    }
    %c0 = arith.constant 0 : index
    %c0_1 = arith.constant 0 : index
    %3 = vector.load %arg7[%c0, %c0_1] : memref<2x32xf32, #tpu.memory_space<vmem>>, vector<2x32xf32>
    %c0_2 = arith.constant 0 : index
    %c0_3 = arith.constant 0 : index
    %c0_4 = arith.constant 0 : index
    %4 = vector.load %arg3[%c0_2, %c0_3, %c0_4] : memref<2x8x32xf32, #tpu.memory_space<vmem>>, vector<2x8x32xf32>
    %c0_5 = arith.constant 0 : index
    %c0_6 = arith.constant 0 : index
    %c0_7 = arith.constant 0 : index
    %5 = vector.load %arg4[%c0_5, %c0_6, %c0_7] : memref<2x8x1xf32, #tpu.memory_space<vmem>>, vector<2x8x1xf32>
    %6 = vector.broadcast %5 : vector<2x8x1xf32> to vector<2x8x32xf32>
    %7 = arith.mulf %4, %6 : vector<2x8x32xf32>
    %cst = arith.constant dense<0.000000e+00> : vector<2x32xf32>
    %8 = vector.multi_reduction <add>, %7, %cst [1] : vector<2x8x32xf32> to vector<2x32xf32>
    %9 = arith.addf %3, %8 : vector<2x32xf32>
    %c0_8 = arith.constant 0 : index
    %c0_9 = arith.constant 0 : index
    %10 = vector.load %arg7[%c0_8, %c0_9] : memref<2x32xf32, #tpu.memory_space<vmem>>, vector<2x32xf32>
    tpu.vector_store %arg7[%c0_8, %c0_9], %9 {strides = array<i32>} : memref<2x32xf32, #tpu.memory_space<vmem>>, vector<2x32xf32>,
    %c0_i32_10 = arith.constant 0 : i32
    %11 = arith.cmpi eq, %arg2, %c0_i32_10 : i32
    %12 = arith.extui %11 : i1 to i32
    %c0_i32_11 = arith.constant 0 : i32
    %13 = arith.cmpi ne, %12, %c0_i32_11 : i32
    scf.if %13 {
      %c0_12 = arith.constant 0 : index
      %c0_13 = arith.constant 0 : index
      %14 = vector.load %arg7[%c0_12, %c0_13] : memref<2x32xf32, #tpu.memory_space<vmem>>, vector<2x32xf32>
      %c0_14 = arith.constant 0 : index
      %c0_15 = arith.constant 0 : index
      %15 = vector.load %arg5[%c0_14, %c0_15] : memref<2x1xf32, #tpu.memory_space<vmem>>, vector<2x1xf32>
      %16 = vector.broadcast %15 : vector<2x1xf32> to vector<2x32xf32>
      %17 = arith.mulf %14, %16 : vector<2x32xf32>
      %c0_16 = arith.constant 0 : index
      %c0_17 = arith.constant 0 : index
      %18 = vector.load %arg6[%c0_16, %c0_17] : memref<2x32xf32, #tpu.memory_space<vmem>>, vector<2x32xf32>
      tpu.vector_store %arg6[%c0_16, %c0_17], %17 {strides = array<i32>} : memref<2x32xf32, #tpu.memory_space<vmem>>, vector<2x32xf32>,
    } else {
    }
    return
  }
  func.func @transform_0(%arg0: i32, %arg1: i32, %arg2: i32) -> (i32, i32, i32) {
    %c0_i32 = arith.constant 0 : i32
    return %arg0, %arg2, %arg1 : i32, i32, i32
  }
  func.func @transform_1(%arg0: i32, %arg1: i32, %arg2: i32) -> (i32, i32, i32) {
    %c0_i32 = arith.constant 0 : i32
    %c0_i32_0 = arith.constant 0 : i32
    return %arg0, %arg2, %c0_i32 : i32, i32, i32
  }
  func.func @transform_2(%arg0: i32, %arg1: i32, %arg2: i32) -> (i32, i32) {
    %c0_i32 = arith.constant 0 : i32
    %c0_i32_0 = arith.constant 0 : i32
    return %arg0, %c0_i32 : i32, i32
  }
  func.func @transform_3(%arg0: i32, %arg1: i32, %arg2: i32) -> (i32, i32) {
    %c0_i32 = arith.constant 0 : i32
    return %arg0, %arg1 : i32, i32
  }
}

</mosaic_0001>

<bundles_post_ra>
// kernel: tpu_custom_call.1
= control target key start
LH: loop header
LB: loop body
LE: loop exit
PB: predicated region body
PF: predicated region fallthrough
CT: control target
= control target key end

     0   :  { %v120_v2 = vmov 0   ;;  %s164_s0 = inlined_call_operand.vmem [shape: f32[2,8,32], index: 0, kind: input, shape index: {}]   ;;  %s165_s1 = inlined_call_operand.vmem [shape: f32[2,8,1], index: 1, kind: input, shape index: {}]   ;;  %s166_s2 = inlined_call_operand.vmem [shape: f32[2,1], index: 2, kind: input, shape index: {}]   ;;  %s167_s3 = inlined_call_operand.hbm [shape: f32[2,32], index: 3, kind: output, shape index: {}]  }
   0x1   :  { %v24_v0 = vld [vmem:[%s165_s1] sm:$0xff]  ;;  %92 = vset.pattern.permute.xlu0 %v120_v2  ;;  %93 = vset.pattern.permute.xlu1 %v120_v2 }
   0x2   :  { %v65_v1 = vld [vmem:[%s166_s2] sm:$0x3] }
   0x3   :  { %8 = vsyncpa [#allocation4], 0  ;;  %28 = vperm.xlu0 %92, %v24_v0   ;;  %68 = vperm.xlu1 %93, %v65_v1   ;;  %v25_v3 = vld [vmem:[%s165_s1 + $0x8] sm:$0xff]  ;;  %vm19_vm0 = vcmask 254976   ;;  %v121_v4 = vmov 0.0   ;;  %v22_v5 = vld [vmem:[%s164_s0] sm:$0xff] }
   0x4   :  { %20 = vst.msk [vmem:[#allocation2] sm:$0x3] %vm19_vm0, %v121_v4  ;;  %vm38_vm1 = vcmask 261120   ;;  %v23_v11 = vld [vmem:[%s164_s0 + $0x8] sm:$0xff]  ;;  %vm55_vm2 = vcmask 1041409   ;;  %s122_s0 = smov [#allocation3]  }
   0x5   :  { %s78_s1 = sshll.u32 %s122_s0, 4  ;;  %s80_s23 = sshll.u32 %s167_s3, 4  ;;  %s79_s1 = int_to_ptr.vmem [resolvable:$true] %s78_s1  ;;  %s81_s23 = int_to_ptr.hbm [resolvable:$true] %s80_s23 }
   0xb   :  { %33 = vperm.xlu0 %92, %v25_v3   ;;  %v21_v25 = vld [vmem:[#allocation2] sm:$0x3] }
  0x75   :  { %v29_v6 = vpop.permute.xlu0 %28  ;;  %v69_v28 = vpop.permute.xlu1 %68 }
  0x76   :  { %v36_v7 = vmul.f32 %v29_v6, %v22_v5 }
  0x78   :  { %v39_v8 = vsel %vm38_vm1, %v36_v7, 0.0 }
  0x79   :  { %v40_v9 = vrot.slane %v39_v8, 4 }
  0x7b   :  { %v41_v10 = vadd.f32 %v40_v9, %v39_v8 }
  0x7d   :  { %v34_v12 = vpop.permute.xlu0 %33  ;;  %v42_v14 = vrot.slane %v41_v10, 2 }
  0x7e   :  { %v37_v13 = vmul.f32 %v34_v12, %v23_v11 }
  0x7f   :  { %v43_v17 = vadd.f32 %v42_v14, %v41_v10 }
  0x80   :  { %v46_v15 = vsel %vm38_vm1, %v37_v13, 0.0 }
  0x81   :  { %v47_v16 = vrot.slane %v46_v15, 4  ;;  %v44_v20 = vrot.slane %v43_v17, 1 }
  0x83   :  { %v48_v18 = vadd.f32 %v47_v16, %v46_v15  ;;  %v45_v23 = vadd.f32 %v44_v20, %v43_v17 }
  0x85   :  { %v49_v19 = vrot.slane %v48_v18, 2 }
  0x87   :  { %v50_v21 = vadd.f32 %v49_v19, %v48_v18 }
  0x89   :  { %v51_v22 = vrot.slane %v50_v21, 1 }
  0x8b   :  { %v52_v24 = vadd.f32 %v51_v22, %v50_v21 }
  0x8d   :  { %v56_v26 = vsel %vm55_vm2, %v52_v24, %v45_v23 }
  0x8e   :  { %v58_v27 = vadd.f32 %v56_v26, %v21_v25 }
  0x90   :  { %60 = vst.msk [vmem:[#allocation2] sm:$0x3] %vm19_vm0, %v58_v27 }
  0x97   :  { %v64_v29 = vld [vmem:[#allocation2] sm:$0x3] }
  0x98   :  { %v71_v30 = vmul.f32 %v69_v28, %v64_v29 }
  0x9a   :  { %72 = vst.msk [vmem:[#allocation3] sm:$0x3] %vm19_vm0, %v71_v30 }
  0x9b   :  { %83 = dma.vmem_to_hbm [thread:$0]  %s79_s1, 32, %s81_s23, [#allocation4]  }
  0x9c   :  { %118 = dma.done.wait [#allocation4], 32  }
  0x9d   :  { %119 = vsyncadd [#allocation4], 4294967264 }
  0x9e   :  { %88 = vsyncpa [#allocation4], 1 }

</bundles_post_ra>
